<compile_context>
chip_gen: v7x
topology: tpu7x:2x2x1
jax: 0.10.0
libtpu: 0.0.40
codegen_flags: <defaults>
</compile_context>

<pallas_src>
import jax
import jax.numpy as jnp
from jax.experimental import pallas as pl
from jax.experimental.pallas import tpu as pltpu


# ----------------------------------------------------------------------------
# Haar DWT matrices (matches DWT.generate_mat for pywt 'haar': rec_lo=[s,s], rec_hi=[s,-s])
# ----------------------------------------------------------------------------
def make_haar_matrices(H, W, dtype):
    s = 2.0 ** -0.5
    lo = jnp.array([s, s], dtype)
    hi = jnp.array([s, -s], dtype)

    def band_mat(n, band):
        rows = jnp.arange(n // 2)
        m = jnp.zeros((n // 2, n), dtype)
        m = m.at[rows, 2 * rows].set(band[0])
        m = m.at[rows, 2 * rows + 1].set(band[1])
        return m

    ml0 = band_mat(H, lo)        # (H//2, H)  left-multiplies x
    mh0 = band_mat(H, hi)        # (H//2, H)
    ml1 = band_mat(W, lo).T      # (W, W//2)  right-multiplies
    mh1 = band_mat(W, hi).T      # (W, W//2)
    return ml0, mh0, ml1, mh1


# ----------------------------------------------------------------------------
# Fused DWT + shared 3x3 conv (stride 1, pad 1) forward
# ----------------------------------------------------------------------------
def dwt_residual_forward(x, conv_w_hwio, conv_b):
    """x: (B, C, H, W) NCHW; conv_w_hwio: (3,3,C,OC); conv_b: (OC,).
    Returns conv(LL), conv(LH), conv(HL), each (B, OC, H//2, W//2) NCHW."""
    B, C, H, W = x.shape
    OC = conv_w_hwio.shape[-1]
    Hh, Wh = H // 2, W // 2
    whc = Wh * C
    f32 = jnp.float32

    # ---- tiny constant operands --------------------------------------------
    ml0, mh0, ml1, mh1 = make_haar_matrices(H, W, f32)
    m0 = jnp.concatenate([ml0, mh0], axis=0)                  # (H, H): rows [L ; H]
    m1 = jnp.concatenate([ml1, mh1], axis=1)                  # (W, W): cols [low | high]
    k1 = jnp.kron(m1, jnp.eye(C, dtype=f32))                  # (W*C, W*C): acts on (w,c)-flat lanes
    # conv weights: per-tap kron with I_Wh -> 3x3 conv over the (w,c)-flat axis is one matmul
    eye_wh = jnp.eye(Wh, dtype=f32)
    wk = jnp.concatenate(
        [jnp.kron(eye_wh, conv_w_hwio[dh, dw].astype(f32))    # (Wh*C, Wh*OC) per tap
         for dh in range(3) for dw in range(3)],
        axis=0)                                               # (9*Wh*C, Wh*OC)
    b_lane = jnp.tile(conv_b.astype(f32), 3 * Wh).reshape(1, 3 * Wh * OC)

    # Only remaining wrapper-side activation layout op: NCHW -> per-image (H, W*C) slab.
    xh = jnp.transpose(x, (0, 2, 3, 1)).reshape(B, H, W * C)

    def kernel(x_ref, m0_ref, k1_ref, wk_ref, b_ref, o_ref, pad_ref):
        xb = x_ref[0]                                                       # (H, W*C)
        # Haar DWT as two merged matmuls; HH lives in y[Hh:, whc:] but is never stored/used.
        t = jnp.dot(m0_ref[...], xb, preferred_element_type=jnp.float32)    # (H, W*C)
        y = jnp.dot(t, k1_ref[...], preferred_element_type=jnp.float32)     # (H, W*C)

        # Zero-padded subbands in VMEM scratch (in-kernel padding, no jnp.pad).
        pad_ref[...] = jnp.zeros_like(pad_ref)
        pad_ref[0, 1:1 + Hh, C:C + whc] = y[0:Hh, 0:whc]                    # LL
        pad_ref[1, 1:1 + Hh, C:C + whc] = y[0:Hh, whc:2 * whc]              # LH
        pad_ref[2, 1:1 + Hh, C:C + whc] = y[Hh:2 * Hh, 0:whc]               # HL

        # im2col conv: one K=9*Wh*C matmul per subband, built from static 2D slices.
        outs = []
        for sb in range(3):
            taps = [pad_ref[sb, dh:dh + Hh, dw * C:dw * C + whc]            # (Hh, Wh*C)
                    for dh in range(3) for dw in range(3)]
            pmat = jnp.concatenate(taps, axis=1)                            # (Hh, 9*Wh*C)
            outs.append(jnp.dot(pmat, wk_ref[...],
                                preferred_element_type=jnp.float32))        # (Hh, Wh*OC)
        res = jnp.concatenate(outs, axis=1) + b_ref[...]                    # (Hh, 3*Wh*OC), lane-dense
        o_ref[0] = res.astype(o_ref.dtype)

    out = pl.pallas_call(
        kernel,
        out_shape=jax.ShapeDtypeStruct((B, Hh, 3 * Wh * OC), x.dtype),
        grid=(B,),
        in_specs=[
            pl.BlockSpec((1, H, W * C), lambda i: (i, 0, 0)),
            pl.BlockSpec((H, H), lambda i: (0, 0)),
            pl.BlockSpec((W * C, W * C), lambda i: (0, 0)),
            pl.BlockSpec((9 * Wh * C, Wh * OC), lambda i: (0, 0)),
            pl.BlockSpec((1, 3 * Wh * OC), lambda i: (0, 0)),
        ],
        out_specs=pl.BlockSpec((1, Hh, 3 * Wh * OC), lambda i: (i, 0, 0)),
        scratch_shapes=[pltpu.VMEM((3, Hh + 2, (Wh + 2) * C), jnp.float32)],
        compiler_params=pltpu.CompilerParams(dimension_semantics=("parallel",)),
    )(xh, m0, k1, wk, b_lane)

    # Unpack the lane-dense slab -> three NCHW tensors (tiny).
    y5 = out.reshape(B, Hh, 3, Wh, OC)
    y5 = jnp.transpose(y5, (2, 0, 4, 1, 3))                   # (3, B, OC, Hh, Wh)
    return y5[0], y5[1], y5[2]


# ----------------------------------------------------------------------------
# Pure-JAX reference for verification
# ----------------------------------------------------------------------------
def reference_forward(x, conv_w_hwio, conv_b):
    B, C, H, W = x.shape
    ml0, mh0, ml1, mh1 = make_haar_matrices(H, W, x.dtype)
    L = jnp.einsum('ph,bchw->bcpw', ml0, x)
    Hm = jnp.einsum('ph,bchw->bcpw', mh0, x)
    LL = jnp.einsum('bcpw,wq->bcpq', L, ml1)
    LH = jnp.einsum('bcpw,wq->bcpq', L, mh1)
    HL = jnp.einsum('bcpw,wq->bcpq', Hm, ml1)

    def conv(z):
        z_nhwc = jnp.transpose(z, (0, 2, 3, 1))
        y = jax.lax.conv_general_dilated(
            z_nhwc, conv_w_hwio, window_strides=(1, 1), padding='SAME',
            dimension_numbers=('NHWC', 'HWIO', 'NHWC'))
        y = y + conv_b.reshape(1, 1, 1, -1)
        return jnp.transpose(y, (0, 3, 1, 2))

    return conv(LL), conv(LH), conv(HL)


if __name__ == "__main__":
    B, C, H, W = 2, 4, 16, 16
    OC = 2 * C

    key = jax.random.PRNGKey(0)
    kx, kw, kb = jax.random.split(key, 3)
    x = jax.random.normal(kx, (B, C, H, W), jnp.float32)
    # Conv2d(in=C, out=2C, kernel=3, stride=1, padding=1); weights stored HWIO.
    conv_w = jax.random.normal(kw, (3, 3, C, OC), jnp.float32) * 0.1
    conv_b = jax.random.normal(kb, (OC,), jnp.float32) * 0.1

    LL, LH, HL = jax.jit(dwt_residual_forward)(x, conv_w, conv_b)
    jax.block_until_ready((LL, LH, HL))

    rLL, rLH, rHL = reference_forward(x, conv_w, conv_b)
    assert LL.shape == (B, OC, H // 2, W // 2)
    assert jnp.allclose(LL, rLL, atol=1e-4), "LL mismatch"
    assert jnp.allclose(LH, rLH, atol=1e-4), "LH mismatch"
    assert jnp.allclose(HL, rHL, atol=1e-4), "HL mismatch"

    print("KERNEL_OK")
</pallas_src>

<mosaic_0001>
module attributes {stable_mosaic.version = 11 : i64} {
  func.func @kernel(%arg0: i32, %arg1: memref<1x16x64xf32, #tpu.memory_space<vmem>>, %arg2: memref<16x16xf32, #tpu.memory_space<vmem>>, %arg3: memref<64x64xf32, #tpu.memory_space<vmem>>, %arg4: memref<288x64xf32, #tpu.memory_space<vmem>>, %arg5: memref<1x192xf32, #tpu.memory_space<vmem>>, %arg6: memref<1x8x192xf32, #tpu.memory_space<vmem>>, %arg7: memref<3x10x40xf32, #tpu.memory_space<vmem>>) attributes {dimension_semantics = [#tpu.dimension_semantics<parallel>], iteration_bounds = array<i64: 2>, scalar_prefetch = 0 : i64, scratch_operands = 1 : i64, tpu.core_type = #tpu.core_type<tc>, window_params = [{transform_indices = @transform_0, window_bounds = array<i64: 1, 16, 64>}, {pipeline_mode = #tpu.pipeline_mode<synchronous>, transform_indices = @transform_1, window_bounds = array<i64: 16, 16>}, {pipeline_mode = #tpu.pipeline_mode<synchronous>, transform_indices = @transform_2, window_bounds = array<i64: 64, 64>}, {pipeline_mode = #tpu.pipeline_mode<synchronous>, transform_indices = @transform_3, window_bounds = array<i64: 288, 64>}, {pipeline_mode = #tpu.pipeline_mode<synchronous>, transform_indices = @transform_4, window_bounds = array<i64: 1, 192>}, {transform_indices = @transform_5, window_bounds = array<i64: 1, 8, 192>}]} {
    %c0 = arith.constant 0 : index
    %c0_0 = arith.constant 0 : index
    %c0_1 = arith.constant 0 : index
    %0 = vector.load %arg1[%c0, %c0_0, %c0_1] : memref<1x16x64xf32, #tpu.memory_space<vmem>>, vector<1x16x64xf32>
    %1 = vector.shape_cast %0 : vector<1x16x64xf32> to vector<16x64xf32>
    %c0_2 = arith.constant 0 : index
    %c0_3 = arith.constant 0 : index
    %2 = vector.load %arg2[%c0_2, %c0_3] : memref<16x16xf32, #tpu.memory_space<vmem>>, vector<16x16xf32>
    %cst = arith.constant dense<0.000000e+00> : vector<16x64xf32>
    %3 = tpu.matmul %2, %1, %cst {dimension_numbers = #tpu.dot_dimension_numbers<[1], [0], [0], [1], [0, 0, 1, 1], [], []>} : vector<16x16xf32>, vector<16x64xf32>, vector<16x64xf32> -> vector<16x64xf32>
    %c0_4 = arith.constant 0 : index
    %c0_5 = arith.constant 0 : index
    %4 = vector.load %arg3[%c0_4, %c0_5] : memref<64x64xf32, #tpu.memory_space<vmem>>, vector<64x64xf32>
    %cst_6 = arith.constant dense<0.000000e+00> : vector<16x64xf32>
    %5 = tpu.matmul %3, %4, %cst_6 {dimension_numbers = #tpu.dot_dimension_numbers<[1], [0], [0], [1], [0, 0, 1, 1], [], []>} : vector<16x64xf32>, vector<64x64xf32>, vector<16x64xf32> -> vector<16x64xf32>
    %cst_7 = arith.constant 0.000000e+00 : f32
    %6 = vector.broadcast %cst_7 : f32 to vector<3x10x40xf32>
    %c0_8 = arith.constant 0 : index
    %c0_9 = arith.constant 0 : index
    %c0_10 = arith.constant 0 : index
    %7 = vector.load %arg7[%c0_8, %c0_9, %c0_10] : memref<3x10x40xf32, #tpu.memory_space<vmem>>, vector<3x10x40xf32>
    tpu.vector_store %arg7[%c0_8, %c0_9, %c0_10], %6 {strides = array<i32>} : memref<3x10x40xf32, #tpu.memory_space<vmem>>, vector<3x10x40xf32>,
    %8 = vector.extract_strided_slice %5 {offsets = [0, 0], sizes = [8, 32], strides = [1, 1]} : vector<16x64xf32> to vector<8x32xf32>
    %c0_11 = arith.constant 0 : index
    %c1 = arith.constant 1 : index
    %c4 = arith.constant 4 : index
    %9 = vector.load %arg7[%c0_11, %c1, %c4] : memref<3x10x40xf32, #tpu.memory_space<vmem>>, vector<1x8x32xf32>
    %10 = vector.shape_cast %9 : vector<1x8x32xf32> to vector<8x32xf32>
    %11 = vector.shape_cast %8 : vector<8x32xf32> to vector<1x8x32xf32>
    tpu.vector_store %arg7[%c0_11, %c1, %c4], %11 {strides = array<i32>} : memref<3x10x40xf32, #tpu.memory_space<vmem>>, vector<1x8x32xf32>,
    %12 = vector.extract_strided_slice %5 {offsets = [0, 32], sizes = [8, 32], strides = [1, 1]} : vector<16x64xf32> to vector<8x32xf32>
    %c1_12 = arith.constant 1 : index
    %c1_13 = arith.constant 1 : index
    %c4_14 = arith.constant 4 : index
    %13 = vector.load %arg7[%c1_12, %c1_13, %c4_14] : memref<3x10x40xf32, #tpu.memory_space<vmem>>, vector<1x8x32xf32>
    %14 = vector.shape_cast %13 : vector<1x8x32xf32> to vector<8x32xf32>
    %15 = vector.shape_cast %12 : vector<8x32xf32> to vector<1x8x32xf32>
    tpu.vector_store %arg7[%c1_12, %c1_13, %c4_14], %15 {strides = array<i32>} : memref<3x10x40xf32, #tpu.memory_space<vmem>>, vector<1x8x32xf32>,
    %16 = vector.extract_strided_slice %5 {offsets = [8, 0], sizes = [8, 32], strides = [1, 1]} : vector<16x64xf32> to vector<8x32xf32>
    %c2 = arith.constant 2 : index
    %c1_15 = arith.constant 1 : index
    %c4_16 = arith.constant 4 : index
    %17 = vector.load %arg7[%c2, %c1_15, %c4_16] : memref<3x10x40xf32, #tpu.memory_space<vmem>>, vector<1x8x32xf32>
    %18 = vector.shape_cast %17 : vector<1x8x32xf32> to vector<8x32xf32>
    %19 = vector.shape_cast %16 : vector<8x32xf32> to vector<1x8x32xf32>
    tpu.vector_store %arg7[%c2, %c1_15, %c4_16], %19 {strides = array<i32>} : memref<3x10x40xf32, #tpu.memory_space<vmem>>, vector<1x8x32xf32>,
    %c0_17 = arith.constant 0 : index
    %c0_18 = arith.constant 0 : index
    %c0_19 = arith.constant 0 : index
    %20 = vector.load %arg7[%c0_17, %c0_18, %c0_19] : memref<3x10x40xf32, #tpu.memory_space<vmem>>, vector<1x8x32xf32>
    %21 = vector.shape_cast %20 : vector<1x8x32xf32> to vector<8x32xf32>
    %c0_20 = arith.constant 0 : index
    %c0_21 = arith.constant 0 : index
    %c4_22 = arith.constant 4 : index
    %22 = vector.load %arg7[%c0_20, %c0_21, %c4_22] : memref<3x10x40xf32, #tpu.memory_space<vmem>>, vector<1x8x32xf32>
    %23 = vector.shape_cast %22 : vector<1x8x32xf32> to vector<8x32xf32>
    %c0_23 = arith.constant 0 : index
    %c0_24 = arith.constant 0 : index
    %c8 = arith.constant 8 : index
    %24 = vector.load %arg7[%c0_23, %c0_24, %c8] : memref<3x10x40xf32, #tpu.memory_space<vmem>>, vector<1x8x32xf32>
    %25 = vector.shape_cast %24 : vector<1x8x32xf32> to vector<8x32xf32>
    %c0_25 = arith.constant 0 : index
    %c1_26 = arith.constant 1 : index
    %c0_27 = arith.constant 0 : index
    %26 = vector.load %arg7[%c0_25, %c1_26, %c0_27] : memref<3x10x40xf32, #tpu.memory_space<vmem>>, vector<1x8x32xf32>
    %27 = vector.shape_cast %26 : vector<1x8x32xf32> to vector<8x32xf32>
    %c0_28 = arith.constant 0 : index
    %c1_29 = arith.constant 1 : index
    %c4_30 = arith.constant 4 : index
    %28 = vector.load %arg7[%c0_28, %c1_29, %c4_30] : memref<3x10x40xf32, #tpu.memory_space<vmem>>, vector<1x8x32xf32>
    %29 = vector.shape_cast %28 : vector<1x8x32xf32> to vector<8x32xf32>
    %c0_31 = arith.constant 0 : index
    %c1_32 = arith.constant 1 : index
    %c8_33 = arith.constant 8 : index
    %30 = vector.load %arg7[%c0_31, %c1_32, %c8_33] : memref<3x10x40xf32, #tpu.memory_space<vmem>>, vector<1x8x32xf32>
    %31 = vector.shape_cast %30 : vector<1x8x32xf32> to vector<8x32xf32>
    %c0_34 = arith.constant 0 : index
    %c2_35 = arith.constant 2 : index
    %c0_36 = arith.constant 0 : index
    %32 = vector.load %arg7[%c0_34, %c2_35, %c0_36] : memref<3x10x40xf32, #tpu.memory_space<vmem>>, vector<1x8x32xf32>
    %33 = vector.shape_cast %32 : vector<1x8x32xf32> to vector<8x32xf32>
    %c0_37 = arith.constant 0 : index
    %c2_38 = arith.constant 2 : index
    %c4_39 = arith.constant 4 : index
    %34 = vector.load %arg7[%c0_37, %c2_38, %c4_39] : memref<3x10x40xf32, #tpu.memory_space<vmem>>, vector<1x8x32xf32>
    %35 = vector.shape_cast %34 : vector<1x8x32xf32> to vector<8x32xf32>
    %c0_40 = arith.constant 0 : index
    %c2_41 = arith.constant 2 : index
    %c8_42 = arith.constant 8 : index
    %36 = vector.load %arg7[%c0_40, %c2_41, %c8_42] : memref<3x10x40xf32, #tpu.memory_space<vmem>>, vector<1x8x32xf32>
    %37 = vector.shape_cast %36 : vector<1x8x32xf32> to vector<8x32xf32>
    %38 = tpu.concatenate %21, %23, %25, %27, %29, %31, %33, %35, %37 in 1 : vector<8x32xf32>, vector<8x32xf32>, vector<8x32xf32>, vector<8x32xf32>, vector<8x32xf32>, vector<8x32xf32>, vector<8x32xf32>, vector<8x32xf32>, vector<8x32xf32> -> vector<8x288xf32>
    %c0_43 = arith.constant 0 : index
    %c0_44 = arith.constant 0 : index
    %39 = vector.load %arg4[%c0_43, %c0_44] : memref<288x64xf32, #tpu.memory_space<vmem>>, vector<288x64xf32>
    %cst_45 = arith.constant dense<0.000000e+00> : vector<8x64xf32>
    %40 = tpu.matmul %38, %39, %cst_45 {dimension_numbers = #tpu.dot_dimension_numbers<[1], [0], [0], [1], [0, 0, 1, 1], [], []>} : vector<8x288xf32>, vector<288x64xf32>, vector<8x64xf32> -> vector<8x64xf32>
    %c1_46 = arith.constant 1 : index
    %c0_47 = arith.constant 0 : index
    %c0_48 = arith.constant 0 : index
    %41 = vector.load %arg7[%c1_46, %c0_47, %c0_48] : memref<3x10x40xf32, #tpu.memory_space<vmem>>, vector<1x8x32xf32>
    %42 = vector.shape_cast %41 : vector<1x8x32xf32> to vector<8x32xf32>
    %c1_49 = arith.constant 1 : index
    %c0_50 = arith.constant 0 : index
    %c4_51 = arith.constant 4 : index
    %43 = vector.load %arg7[%c1_49, %c0_50, %c4_51] : memref<3x10x40xf32, #tpu.memory_space<vmem>>, vector<1x8x32xf32>
    %44 = vector.shape_cast %43 : vector<1x8x32xf32> to vector<8x32xf32>
    %c1_52 = arith.constant 1 : index
    %c0_53 = arith.constant 0 : index
    %c8_54 = arith.constant 8 : index
    %45 = vector.load %arg7[%c1_52, %c0_53, %c8_54] : memref<3x10x40xf32, #tpu.memory_space<vmem>>, vector<1x8x32xf32>
    %46 = vector.shape_cast %45 : vector<1x8x32xf32> to vector<8x32xf32>
    %c1_55 = arith.constant 1 : index
    %c1_56 = arith.constant 1 : index
    %c0_57 = arith.constant 0 : index
    %47 = vector.load %arg7[%c1_55, %c1_56, %c0_57] : memref<3x10x40xf32, #tpu.memory_space<vmem>>, vector<1x8x32xf32>
    %48 = vector.shape_cast %47 : vector<1x8x32xf32> to vector<8x32xf32>
    %c1_58 = arith.constant 1 : index
    %c1_59 = arith.constant 1 : index
    %c4_60 = arith.constant 4 : index
    %49 = vector.load %arg7[%c1_58, %c1_59, %c4_60] : memref<3x10x40xf32, #tpu.memory_space<vmem>>, vector<1x8x32xf32>
    %50 = vector.shape_cast %49 : vector<1x8x32xf32> to vector<8x32xf32>
    %c1_61 = arith.constant 1 : index
    %c1_62 = arith.constant 1 : index
    %c8_63 = arith.constant 8 : index
    %51 = vector.load %arg7[%c1_61, %c1_62, %c8_63] : memref<3x10x40xf32, #tpu.memory_space<vmem>>, vector<1x8x32xf32>
    %52 = vector.shape_cast %51 : vector<1x8x32xf32> to vector<8x32xf32>
    %c1_64 = arith.constant 1 : index
    %c2_65 = arith.constant 2 : index
    %c0_66 = arith.constant 0 : index
    %53 = vector.load %arg7[%c1_64, %c2_65, %c0_66] : memref<3x10x40xf32, #tpu.memory_space<vmem>>, vector<1x8x32xf32>
    %54 = vector.shape_cast %53 : vector<1x8x32xf32> to vector<8x32xf32>
    %c1_67 = arith.constant 1 : index
    %c2_68 = arith.constant 2 : index
    %c4_69 = arith.constant 4 : index
    %55 = vector.load %arg7[%c1_67, %c2_68, %c4_69] : memref<3x10x40xf32, #tpu.memory_space<vmem>>, vector<1x8x32xf32>
    %56 = vector.shape_cast %55 : vector<1x8x32xf32> to vector<8x32xf32>
    %c1_70 = arith.constant 1 : index
    %c2_71 = arith.constant 2 : index
    %c8_72 = arith.constant 8 : index
    %57 = vector.load %arg7[%c1_70, %c2_71, %c8_72] : memref<3x10x40xf32, #tpu.memory_space<vmem>>, vector<1x8x32xf32>
    %58 = vector.shape_cast %57 : vector<1x8x32xf32> to vector<8x32xf32>
    %59 = tpu.concatenate %42, %44, %46, %48, %50, %52, %54, %56, %58 in 1 : vector<8x32xf32>, vector<8x32xf32>, vector<8x32xf32>, vector<8x32xf32>, vector<8x32xf32>, vector<8x32xf32>, vector<8x32xf32>, vector<8x32xf32>, vector<8x32xf32> -> vector<8x288xf32>
    %c0_73 = arith.constant 0 : index
    %c0_74 = arith.constant 0 : index
    %60 = vector.load %arg4[%c0_73, %c0_74] : memref<288x64xf32, #tpu.memory_space<vmem>>, vector<288x64xf32>
    %cst_75 = arith.constant dense<0.000000e+00> : vector<8x64xf32>
    %61 = tpu.matmul %59, %60, %cst_75 {dimension_numbers = #tpu.dot_dimension_numbers<[1], [0], [0], [1], [0, 0, 1, 1], [], []>} : vector<8x288xf32>, vector<288x64xf32>, vector<8x64xf32> -> vector<8x64xf32>
    %c2_76 = arith.constant 2 : index
    %c0_77 = arith.constant 0 : index
    %c0_78 = arith.constant 0 : index
    %62 = vector.load %arg7[%c2_76, %c0_77, %c0_78] : memref<3x10x40xf32, #tpu.memory_space<vmem>>, vector<1x8x32xf32>
    %63 = vector.shape_cast %62 : vector<1x8x32xf32> to vector<8x32xf32>
    %c2_79 = arith.constant 2 : index
    %c0_80 = arith.constant 0 : index
    %c4_81 = arith.constant 4 : index
    %64 = vector.load %arg7[%c2_79, %c0_80, %c4_81] : memref<3x10x40xf32, #tpu.memory_space<vmem>>, vector<1x8x32xf32>
    %65 = vector.shape_cast %64 : vector<1x8x32xf32> to vector<8x32xf32>
    %c2_82 = arith.constant 2 : index
    %c0_83 = arith.constant 0 : index
    %c8_84 = arith.constant 8 : index
    %66 = vector.load %arg7[%c2_82, %c0_83, %c8_84] : memref<3x10x40xf32, #tpu.memory_space<vmem>>, vector<1x8x32xf32>
    %67 = vector.shape_cast %66 : vector<1x8x32xf32> to vector<8x32xf32>
    %c2_85 = arith.constant 2 : index
    %c1_86 = arith.constant 1 : index
    %c0_87 = arith.constant 0 : index
    %68 = vector.load %arg7[%c2_85, %c1_86, %c0_87] : memref<3x10x40xf32, #tpu.memory_space<vmem>>, vector<1x8x32xf32>
    %69 = vector.shape_cast %68 : vector<1x8x32xf32> to vector<8x32xf32>
    %c2_88 = arith.constant 2 : index
    %c1_89 = arith.constant 1 : index
    %c4_90 = arith.constant 4 : index
    %70 = vector.load %arg7[%c2_88, %c1_89, %c4_90] : memref<3x10x40xf32, #tpu.memory_space<vmem>>, vector<1x8x32xf32>
    %71 = vector.shape_cast %70 : vector<1x8x32xf32> to vector<8x32xf32>
    %c2_91 = arith.constant 2 : index
    %c1_92 = arith.constant 1 : index
    %c8_93 = arith.constant 8 : index
    %72 = vector.load %arg7[%c2_91, %c1_92, %c8_93] : memref<3x10x40xf32, #tpu.memory_space<vmem>>, vector<1x8x32xf32>
    %73 = vector.shape_cast %72 : vector<1x8x32xf32> to vector<8x32xf32>
    %c2_94 = arith.constant 2 : index
    %c2_95 = arith.constant 2 : index
    %c0_96 = arith.constant 0 : index
    %74 = vector.load %arg7[%c2_94, %c2_95, %c0_96] : memref<3x10x40xf32, #tpu.memory_space<vmem>>, vector<1x8x32xf32>
    %75 = vector.shape_cast %74 : vector<1x8x32xf32> to vector<8x32xf32>
    %c2_97 = arith.constant 2 : index
    %c2_98 = arith.constant 2 : index
    %c4_99 = arith.constant 4 : index
    %76 = vector.load %arg7[%c2_97, %c2_98, %c4_99] : memref<3x10x40xf32, #tpu.memory_space<vmem>>, vector<1x8x32xf32>
    %77 = vector.shape_cast %76 : vector<1x8x32xf32> to vector<8x32xf32>
    %c2_100 = arith.constant 2 : index
    %c2_101 = arith.constant 2 : index
    %c8_102 = arith.constant 8 : index
    %78 = vector.load %arg7[%c2_100, %c2_101, %c8_102] : memref<3x10x40xf32, #tpu.memory_space<vmem>>, vector<1x8x32xf32>
    %79 = vector.shape_cast %78 : vector<1x8x32xf32> to vector<8x32xf32>
    %80 = tpu.concatenate %63, %65, %67, %69, %71, %73, %75, %77, %79 in 1 : vector<8x32xf32>, vector<8x32xf32>, vector<8x32xf32>, vector<8x32xf32>, vector<8x32xf32>, vector<8x32xf32>, vector<8x32xf32>, vector<8x32xf32>, vector<8x32xf32> -> vector<8x288xf32>
    %c0_103 = arith.constant 0 : index
    %c0_104 = arith.constant 0 : index
    %81 = vector.load %arg4[%c0_103, %c0_104] : memref<288x64xf32, #tpu.memory_space<vmem>>, vector<288x64xf32>
    %cst_105 = arith.constant dense<0.000000e+00> : vector<8x64xf32>
    %82 = tpu.matmul %80, %81, %cst_105 {dimension_numbers = #tpu.dot_dimension_numbers<[1], [0], [0], [1], [0, 0, 1, 1], [], []>} : vector<8x288xf32>, vector<288x64xf32>, vector<8x64xf32> -> vector<8x64xf32>
    %83 = tpu.concatenate %40, %61, %82 in 1 : vector<8x64xf32>, vector<8x64xf32>, vector<8x64xf32> -> vector<8x192xf32>
    %c0_106 = arith.constant 0 : index
    %c0_107 = arith.constant 0 : index
    %84 = vector.load %arg5[%c0_106, %c0_107] : memref<1x192xf32, #tpu.memory_space<vmem>>, vector<1x192xf32>
    %85 = vector.broadcast %84 : vector<1x192xf32> to vector<8x192xf32>
    %86 = arith.addf %83, %85 : vector<8x192xf32>
    %c0_108 = arith.constant 0 : index
    %c0_109 = arith.constant 0 : index
    %c0_110 = arith.constant 0 : index
    %87 = vector.load %arg6[%c0_108, %c0_109, %c0_110] : memref<1x8x192xf32, #tpu.memory_space<vmem>>, vector<1x8x192xf32>
    %88 = vector.shape_cast %87 : vector<1x8x192xf32> to vector<8x192xf32>
    %89 = vector.shape_cast %86 : vector<8x192xf32> to vector<1x8x192xf32>
    tpu.vector_store %arg6[%c0_108, %c0_109, %c0_110], %89 {strides = array<i32>} : memref<1x8x192xf32, #tpu.memory_space<vmem>>, vector<1x8x192xf32>,
    return
  }
  func.func @transform_0(%arg0: i32) -> (i32, i32, i32) {
    %c0_i32 = arith.constant 0 : i32
    %c0_i32_0 = arith.constant 0 : i32
    %c0_i32_1 = arith.constant 0 : i32
    return %arg0, %c0_i32, %c0_i32_0 : i32, i32, i32
  }
  func.func @transform_1(%arg0: i32) -> (i32, i32) {
    %c0_i32 = arith.constant 0 : i32
    %c0_i32_0 = arith.constant 0 : i32
    %c0_i32_1 = arith.constant 0 : i32
    return %c0_i32, %c0_i32_0 : i32, i32
  }
  func.func @transform_2(%arg0: i32) -> (i32, i32) {
    %c0_i32 = arith.constant 0 : i32
    %c0_i32_0 = arith.constant 0 : i32
    %c0_i32_1 = arith.constant 0 : i32
    return %c0_i32, %c0_i32_0 : i32, i32
  }
  func.func @transform_3(%arg0: i32) -> (i32, i32) {
    %c0_i32 = arith.constant 0 : i32
    %c0_i32_0 = arith.constant 0 : i32
    %c0_i32_1 = arith.constant 0 : i32
    return %c0_i32, %c0_i32_0 : i32, i32
  }
  func.func @transform_4(%arg0: i32) -> (i32, i32) {
    %c0_i32 = arith.constant 0 : i32
    %c0_i32_0 = arith.constant 0 : i32
    %c0_i32_1 = arith.constant 0 : i32
    return %c0_i32, %c0_i32_0 : i32, i32
  }
  func.func @transform_5(%arg0: i32) -> (i32, i32, i32) {
    %c0_i32 = arith.constant 0 : i32
    %c0_i32_0 = arith.constant 0 : i32
    %c0_i32_1 = arith.constant 0 : i32
    return %arg0, %c0_i32, %c0_i32_0 : i32, i32, i32
  }
}

</mosaic_0001>

<bundles_post_ra>
// kernel: tile.8
= control target key start
LH: loop header
LB: loop body
LE: loop exit
PB: predicated region body
PF: predicated region fallthrough
CT: control target
= control target key end

     0   :  { %s34_s0 = inlined_call_operand.vmem [shape: f32[8], index: 0, kind: input, shape index: {}]   ;;  %s35_s1 = inlined_call_operand.vmem [shape: f32[24,8], index: 1, kind: output, shape index: {}]  }
   0x1   :  { %v4_v0 = vld [vmem:[%s34_s0] ss:$0 sm:$0xff] }
   0x2   :  { %5 = vst [vmem:[%s35_s1] sm:$0xff] %v4_v0  ;;  %10 = vst [vmem:[%s35_s1 + $0x8] sm:$0xff] %v4_v0 }
   0x3   :  { %11 = vst [vmem:[%s35_s1 + $0x10] sm:$0xff] %v4_v0 }

// kernel: tile.9
= control target key start
LH: loop header
LB: loop body
LE: loop exit
PB: predicated region body
PF: predicated region fallthrough
CT: control target
= control target key end

     0   :  { %s145_s10 = smov 120   ;;  %s146_s11 = smov 104   ;;  %vm4_vm0 = vcmask 64512   ;;  %vm10_vm1 = vcmask 1048512   ;;  %vm16_vm2 = vcmask 982912   ;;  %vm22_vm3 = vcmask 917312   ;;  %s224_s0 = inlined_call_operand.vmem [shape: f32[24,8], index: 0, kind: input, shape index: {}]   ;;  %s225_s1 = inlined_call_operand.vmem [shape: f32[1,192], index: 1, kind: output, shape index: {}]  }
   0x1   :  { %v114_v0 = vld [vmem:[%s224_s0 + $0xf] sm:$0x1]   ;;  %v116_v1 = vld [vmem:[%s224_s0 + $0xd] sm:$0x1]   ;;  %v115_v2 = vld [vmem:[%s224_s0 + $0xe] sm:$0x1]  }
   0x2   :  { %8 = vrot.lane.b32.xlu0 %v114_v0, %s145_s10  ;;  %20 = vrot.lane.b32.xlu1 %v116_v1, %s146_s11  ;;  %v117_v3 = vld [vmem:[%s224_s0 + $0xc] sm:$0x1]   ;;  %s147_s16 = smov 112   ;;  %s148_s17 = smov 96   ;;  %v118_v4 = vld [vmem:[%s224_s0 + $0xb] sm:$0x1]  }
   0x3   :  { %v119_v5 = vld [vmem:[%s224_s0 + $0xa] sm:$0x1]   ;;  %s149_s22 = smov 88   ;;  %s150_s23 = smov 80   ;;  %v120_v6 = vld [vmem:[%s224_s0 + $0x9] sm:$0x1]  }
   0x4   :  { %v121_v7 = vld [vmem:[%s224_s0 + $0x8] sm:$0x1]   ;;  %s55_s28 = smov 3  ;;  %s62_s29 = smov 3  ;;  %vm28_vm4 = vcmask 851712   ;;  %vm34_vm5 = vcmask 786112  }
   0x5   :  { %s2_s30 = smov 3  ;;  %s151_s4 = smov 72   ;;  %v122_v9 = vld [vmem:[%s224_s0 + $0x7] ss:$16 sm:%s55_s28]   ;;  %v123_v10 = vld [vmem:[%s224_s0 + $0x6] ss:$16 sm:%s62_s29]  }
   0x6   :  { %14 = vrot.lane.b32.xlu0 %v115_v2, %s147_s16  ;;  %26 = vrot.lane.b32.xlu1 %v117_v3, %s148_s17  ;;  %v3_v8 = vld [vmem:[%s224_s0] ss:$16 sm:%s2_s30]   ;;  %s152_s5 = smov 64   ;;  %s69_s10 = smov 3  ;;  %vm40_vm6 = vcmask 720512   ;;  %vm46_vm7 = vcmask 654912  }
   0x7   :  { %5 = vst.msk [vmem:[#allocation0] ss:$8 sm:$0x3] %vm4_vm0, %v3_v8   ;;  %s76_s11 = smov 3  ;;  %s153_s12 = smov 56   ;;  %vm52_vm8 = vcmask 589312  }
   0x8   :  { %s154_s13 = smov 48   ;;  %v124_v11 = vld [vmem:[%s224_s0 + $0x5] ss:$16 sm:%s69_s10]   ;;  %v125_v12 = vld [vmem:[%s224_s0 + $0x4] ss:$16 sm:%s76_s11]   ;;  %s83_s18 = smov 3 }
   0x9   :  { %s90_s19 = smov 3  ;;  %s155_s20 = smov 40   ;;  %v126_v13 = vld [vmem:[%s224_s0 + $0x3] ss:$16 sm:%s83_s18]   ;;  %vm59_vm9 = vcmask 523712   ;;  %vm66_vm10 = vcmask 458112  }
   0xa   :  { %32 = vrot.lane.b32.xlu0 %v118_v4, %s149_s22  ;;  %38 = vrot.lane.b32.xlu1 %v119_v5, %s150_s23  ;;  %s156_s21 = smov 32   ;;  %v127_v14 = vld [vmem:[%s224_s0 + $0x2] ss:$16 sm:%s90_s19]   ;;  %s97_s26 = smov 3  ;;  %vm73_vm11 = vcmask 392512   ;;  %vm80_vm12 = vcmask 326912  }
   0xb   :  { %s157_s27 = smov 24   ;;  %s158_s28 = smov 16   ;;  %v128_v15 = vld [vmem:[%s224_s0 + $0x1] ss:$16 sm:%s97_s26]   ;;  %vm87_vm13 = vcmask 261312   ;;  %vm94_vm14 = vcmask 195712  }
   0xc   :  { %s159_s0 = smov 8   ;;  %vm101_vm15 = vcmask 130112  }
   0xe   :  { %44 = vrot.lane.b32.xlu0 %v120_v6, %s151_s4  ;;  %50 = vrot.lane.b32.xlu1 %v121_v7, %s152_s5 }
  0x12   :  { %57 = vrot.lane.b32.xlu0 %v122_v9, %s153_s12  ;;  %64 = vrot.lane.b32.xlu1 %v123_v10, %s154_s13 }
  0x16   :  { %71 = vrot.lane.b32.xlu0 %v124_v11, %s155_s20  ;;  %78 = vrot.lane.b32.xlu1 %v125_v12, %s156_s21 }
  0x1a   :  { %85 = vrot.lane.b32.xlu0 %v126_v13, %s157_s27  ;;  %92 = vrot.lane.b32.xlu1 %v127_v14, %s158_s28 }
  0x1e   :  { %99 = vrot.lane.b32.xlu0 %v128_v15, %s159_s0 }
  0x74   :  { %v9_v16 = vpop.permute.xlu0 %8   ;;  %v21_v17 = vpop.permute.xlu1 %20  }
  0x75   :  { %11 = vst.msk [vmem:[#allocation0] sm:$0x1] %vm10_vm1, %v9_v16  }
  0x78   :  { %v15_v18 = vpop.permute.xlu0 %14   ;;  %v27_v19 = vpop.permute.xlu1 %26  }
  0x79   :  { %17 = vst.msk [vmem:[#allocation0] sm:$0x1] %vm16_vm2, %v15_v18  }
  0x7a   :  { %23 = vst.msk [vmem:[#allocation0] sm:$0x1] %vm22_vm3, %v21_v17  }
  0x7b   :  { %29 = vst.msk [vmem:[#allocation0] sm:$0x1] %vm28_vm4, %v27_v19  }
  0x7c   :  { %v33_v20 = vpop.permute.xlu0 %32   ;;  %v39_v21 = vpop.permute.xlu1 %38  }
  0x7d   :  { %35 = vst.msk [vmem:[#allocation0] sm:$0x1] %vm34_vm5, %v33_v20  }
  0x7e   :  { %41 = vst.msk [vmem:[#allocation0] sm:$0x1] %vm40_vm6, %v39_v21  }
  0x80   :  { %v45_v22 = vpop.permute.xlu0 %44   ;;  %v51_v23 = vpop.permute.xlu1 %50  }
  0x81   :  { %47 = vst.msk [vmem:[#allocation0] sm:$0x1] %vm46_vm7, %v45_v22  }
  0x82   :  { %53 = vst.msk [vmem:[#allocation0] sm:$0x1] %vm52_vm8, %v51_v23  }
  0x84   :  { %v58_v24 = vpop.permute.xlu0 %57   ;;  %v65_v25 = vpop.permute.xlu1 %64  }
  0x85   :  { %60 = vst.msk [vmem:[#allocation0] ss:$8 sm:$0x3] %vm59_vm9, %v58_v24  }
  0x86   :  { %67 = vst.msk [vmem:[#allocation0] ss:$8 sm:$0x3] %vm66_vm10, %v65_v25  }
  0x88   :  { %v72_v26 = vpop.permute.xlu0 %71   ;;  %v79_v27 = vpop.permute.xlu1 %78  }
  0x89   :  { %74 = vst.msk [vmem:[#allocation0] ss:$8 sm:$0x3] %vm73_vm11, %v72_v26  }
  0x8a   :  { %81 = vst.msk [vmem:[#allocation0] ss:$8 sm:$0x3] %vm80_vm12, %v79_v27  }
  0x8c   :  { %v86_v28 = vpop.permute.xlu0 %85   ;;  %v93_v29 = vpop.permute.xlu1 %92  }
  0x8d   :  { %88 = vst.msk [vmem:[#allocation0] ss:$8 sm:$0x3] %vm87_vm13, %v86_v28  }
  0x8e   :  { %95 = vst.msk [vmem:[#allocation0] ss:$8 sm:$0x3] %vm94_vm14, %v93_v29  }
  0x90   :  { %v100_v30 = vpop.permute.xlu0 %99  }
  0x91   :  { %102 = vst.msk [vmem:[#allocation0] ss:$8 sm:$0x3] %vm101_vm15, %v100_v30  }
  0x98   :  { %v106_v31 = vld [vmem:[#allocation0] sm:$0x1]  ;;  %v110_v32 = vld [vmem:[#allocation0 + $0x8] sm:$0x1] }
  0x99   :  { %108 = vst [vmem:[%s225_s1] sm:$0x1] %v106_v31  ;;  %129 = vst [vmem:[%s225_s1 + $0x1] sm:$0x1] %v110_v32 }

// kernel: dwt_residual_forward.1
= control target key start
LH: loop header
LB: loop body
LE: loop exit
PB: predicated region body
PF: predicated region fallthrough
CT: control target
= control target key end

     0   :  { %s1515_s18 = smov 0   ;;  %s1852_s0 = inlined_call_operand.vmem [shape: f32[2,16,64], index: 0, kind: input, shape index: {}]   ;;  %s1853_s1 = inlined_call_operand.vmem [shape: f32[16,16], index: 1, kind: input, shape index: {}]   ;;  %s1854_s2 = inlined_call_operand.vmem [shape: f32[64,64], index: 2, kind: input, shape index: {}]   ;;  %s1855_s3 = inlined_call_operand.vmem [shape: f32[288,64], index: 3, kind: input, shape index: {}]   ;;  %s1856_s4 = inlined_call_operand.vmem [shape: f32[1,192], index: 4, kind: input, shape index: {}]   ;;  %s1857_s5 = inlined_call_operand.vmem [shape: f32[2,8,192], index: 5, kind: output, shape index: {}]  }
   0x1 LB: > { %s1071_s19 = sadd.s32 4294967295, %s1470_s18   ;;  %p1075_p0 = scmp.ge.s32.totalorder %s1470_s18, 1  ;;  %s1470_s18 = sphi %s1515_s18, %s15_s18  }
   0x2   : > { %p187_p1 = scmp.lt.s32.totalorder %s1470_s18, 3 }
   0x4   : > { %p188_p2 = pnand %p1075_p0, %p187_p1 }
   0x5   : > { %p215_p3 = scmp.lt.s32.totalorder (!%p188_p2), %s1071_s19, 1  ;;  %v227_v0 = vld [vmem:[%s1853_s1] sm:$0xff] (!%p188_p2)  ;;  %vm229_vm0 = vcmask (!%p188_p2), 130048   ;;  %v312_v2 = vld [vmem:[%s1854_s2 + $0x8] sm:$0xff] (!%p188_p2)  ;;  %v313_v7 = vld [vmem:[%s1854_s2 + $0x10] sm:$0xff] (!%p188_p2)  ;;  %vm319_vm1 = vcmask (!%p188_p2), 523264  }
   0x6   : > { %191 = sbr.rel (%p188_p2) target bundleno = 1056 (0x420), region = 40  ;;  %1229 = vmatprep.mubr.msk.f32.mxu1 (!%p188_p2), %vm229_vm0, %v227_v0  ;;  %v311_v1 = vld [vmem:[%s1854_s2] sm:$0xff] (!%p188_p2)  ;;  %v314_v8 = vld [vmem:[%s1854_s2 + $0x18] sm:$0xff] (!%p188_p2)  ;;  %v228_v9 = vld [vmem:[%s1853_s1 + $0x8] sm:$0xff] (!%p188_p2)  ;;  %vm401_vm2 = vcmask (!%p188_p2), 326656   ;;  %vm403_vm3 = vcmask (!%p188_p2), 320512  }
   0x7   : > { %v1288_v6 = vpack.c.bf16 (!%p188_p2), %v312_v2, %v311_v1  ;;  %v1292_v10 = vpack.c.bf16 (!%p188_p2), %v314_v8, %v313_v7  ;;  %v315_v11 = vld [vmem:[%s1854_s2 + $0x20] sm:$0xff] (!%p188_p2)  ;;  %v316_v12 = vld [vmem:[%s1854_s2 + $0x28] sm:$0xff] (!%p188_p2)  ;;  %v317_v14 = vld [vmem:[%s1854_s2 + $0x30] sm:$0xff] (!%p188_p2)  ;;  %v1472_v19 = vmov (!%p188_p2), 0.0   ;;  %s1473_s21 = smov (!%p188_p2), 4   ;;  %s1474_s23 = smov (!%p188_p2), 100  }
   0x8   : > { %v1296_v13 = vpack.c.bf16 (!%p188_p2), %v316_v12, %v315_v11  ;;  %v318_v15 = vld [vmem:[%s1854_s2 + $0x38] sm:$0xff] (!%p188_p2)  ;;  %402 = vst.msk [vmem:[#allocation2] sm:$0xff] (!%p188_p2), %vm401_vm2, %v1472_v19  ;;  %405 = vst.msk [vmem:[#allocation2 + $0x10] sm:$0xff] (!%p188_p2), %vm401_vm2, %v1472_v19  ;;  %v479_v22 = vld [vmem:[%s1855_s3 + $0x80] sm:$0xff] (!%p188_p2)  ;;  %v1475_v29 = vmov (!%p188_p2), 0.0|0.0   ;;  %vm1476_vm4 = vmmov (!%p188_p2), 0  }
   0x9   : > { %v1300_v16 = vpack.c.bf16 (!%p188_p2), %v318_v15, %v317_v14  ;;  %404 = vst.msk [vmem:[#allocation2 + $0x8] sm:$0x3] (!%p188_p2), %vm403_vm3, %v1472_v19  ;;  %406 = vst.msk [vmem:[#allocation2 + $0x18] sm:$0x3] (!%p188_p2), %vm403_vm3, %v1472_v19  ;;  %v480_v23 = vld [vmem:[%s1855_s3 + $0x88] sm:$0xff] (!%p188_p2)  ;;  %v463_v24 = vld [vmem:[%s1855_s3] sm:$0xff] (!%p188_p2) }
   0xa   : > { %407 = vst.msk [vmem:[#allocation2 + $0x20] sm:$0xff] (!%p188_p2), %vm401_vm2, %v1472_v19  ;;  %v1583_v25 = vpack.c.bf16 (!%p188_p2), %v480_v23, %v479_v22  ;;  %v464_v26 = vld [vmem:[%s1855_s3 + $0x8] sm:$0xff] (!%p188_p2)  ;;  %v481_v27 = vld [vmem:[%s1855_s3 + $0x90] sm:$0xff] (!%p188_p2)  ;;  %v482_v28 = vld [vmem:[%s1855_s3 + $0x98] sm:$0xff] (!%p188_p2)  ;;  %vm413_vm5 = vcmask (!%p188_p2), 293920   ;;  %s1477_s25 = smov (!%p188_p2), 120  }
   0xb   : > { %408 = vst.msk [vmem:[#allocation2 + $0x28] sm:$0x3] (!%p188_p2), %vm403_vm3, %v1472_v19  ;;  %v1597_v30 = vpack.c.bf16 (!%p188_p2), %v464_v26, %v463_v24  ;;  %v1599_v31 = vpack.c.bf16 (!%p188_p2), %v482_v28, %v481_v27  ;;  %v465_v32 = vld [vmem:[%s1855_s3 + $0x10] sm:$0xff] (!%p188_p2)  ;;  %v466_v33 = vld [vmem:[%s1855_s3 + $0x18] sm:$0xff] (!%p188_p2)  ;;  %v495_v34 = vld [vmem:[%s1855_s3 + $0x100] sm:$0xff] (!%p188_p2)  ;;  %s1478_s9 = smov (!%p188_p2), 124  }
   0xc   : > { %1305 = vmatprep.subr.bf16.mxu0 (!%p188_p2), %v1583_v25  ;;  %v496_v35 = vld [vmem:[%s1855_s3 + $0x108] sm:$0xff] (!%p188_p2)  ;;  %v483_v36 = vld [vmem:[%s1855_s3 + $0xa0] sm:$0xff] (!%p188_p2)  ;;  %v1621_v38 = vpack.c.bf16 (!%p188_p2), %v466_v33, %v465_v32  ;;  %v497_v40 = vld [vmem:[%s1855_s3 + $0x110] sm:$0xff] (!%p188_p2)  ;;  %s1479_s10 = smov (!%p188_p2), 24   ;;  %s1480_s11 = smov (!%p188_p2), 28   ;;  %vm455_vm6 = vcmask (!%p188_p2), 261120  }
   0xd   : > { %s1859_s19 = smov (!%p215_p3, %s1071_s19), 1  ;;  %v484_v37 = vld [vmem:[%s1855_s3 + $0xa8] sm:$0xff]  ;;  %1307 = vmatpush3.bf16.msra.mxu0 %v1597_v30  ;;  %v1623_v39 = vpack.c.bf16 %v496_v35, %v495_v34  ;;  %v467_v42 = vld [vmem:[%s1855_s3 + $0x20] sm:$0xff]  ;;  %v498_v44 = vld [vmem:[%s1855_s3 + $0x118] sm:$0xff]  ;;  %s1482_s12 = smov 56   ;;  %vm458_vm7 = vcmask 785408  }
   0xe   : > { %s1089_s22 = sshll.u32 %s1859_s19, 4  ;;  %1309 = vmatprep.subr.bf16.mxu0 %v1599_v31  ;;  %v1629_v41 = vpack.c.bf16 %v484_v37, %v483_v36  ;;  %v468_v43 = vld [vmem:[%s1855_s3 + $0x28] sm:$0xff]  ;;  %v1641_v45 = vpack.c.bf16 %v498_v44, %v497_v40  ;;  %v485_v46 = vld [vmem:[%s1855_s3 + $0xb0] sm:$0xff]  ;;  %v486_v47 = vld [vmem:[%s1855_s3 + $0xb8] sm:$0xff]  ;;  %s1483_s13 = smov 92  }
   0xf   : > { %s219_s29 = scalar_lea.vmem %s1852_s0, %s1089_s22  ;;  %v1651_v48 = vpack.c.bf16 %v468_v43, %v467_v42  ;;  %v1654_v49 = vpack.c.bf16 %v486_v47, %v485_v46  ;;  %v469_v50 = vld [vmem:[%s1855_s3 + $0x30] sm:$0xff]  ;;  %v470_v51 = vld [vmem:[%s1855_s3 + $0x38] sm:$0xff]  ;;  %v487_v53 = vld [vmem:[%s1855_s3 + $0xc0] sm:$0xff]  ;;  %s1484_s14 = smov 96  }
  0x10   : > { %v225_v3 = vld [vmem:[%s219_s29] sm:$0xff]  ;;  %v226_v4 = vld [vmem:[%s219_s29 + $0x8] sm:$0xff]  ;;  %v1665_v52 = vpack.c.bf16 %v470_v51, %v469_v50  ;;  %v489_v60 = vld [vmem:[%s1855_s3 + $0xd0] sm:$0xff] }
  0x11   : > { %v1284_v5 = vpack.c.bf16 %v226_v4, %v225_v3  ;;  %1311 = vmatpush3.bf16.msra.mxu0 %v1621_v38  ;;  %v488_v54 = vld [vmem:[%s1855_s3 + $0xc8] sm:$0xff]  ;;  %v471_v56 = vld [vmem:[%s1855_s3 + $0x40] sm:$0xff]  ;;  %v490_v61 = vld [vmem:[%s1855_s3 + $0xd8] sm:$0xff] }
  0x12   : > { %1313 = vmatprep.subr.bf16.mxu0 %v1629_v41  ;;  %v1675_v55 = vpack.c.bf16 %v488_v54, %v487_v53  ;;  %v472_v57 = vld [vmem:[%s1855_s3 + $0x48] sm:$0xff]  ;;  %v1694_v62 = vpack.c.bf16 %v490_v61, %v489_v60  ;;  %v473_v63 = vld [vmem:[%s1855_s3 + $0x50] sm:$0xff]  ;;  %v474_v0 = vld [vmem:[%s1855_s3 + $0x58] sm:$0xff] }
  0x13   : > { %1285 = vmatprep.subr.bf16.mxu1 %v1284_v5  ;;  %v1683_v58 = vpack.c.bf16 %v472_v57, %v471_v56  ;;  %v1702_v1 = vpack.c.bf16 %v474_v0, %v473_v63  ;;  %v491_v3 = vld [vmem:[%s1855_s3 + $0xe0] sm:$0xff]  ;;  %v492_v4 = vld [vmem:[%s1855_s3 + $0xe8] sm:$0xff]  ;;  %v494_v11 = vld [vmem:[%s1855_s3 + $0xf8] sm:$0xff] }
  0x14   : > { %1287 = vmatpush3.bf16.msra.mxu1 %v1284_v5  ;;  %v1713_v5 = vpack.c.bf16 %v492_v4, %v491_v3  ;;  %v476_v7 = vld [vmem:[%s1855_s3 + $0x68] sm:$0xff]  ;;  %v477_v12 = vld [vmem:[%s1855_s3 + $0x70] sm:$0xff]  ;;  %v478_v14 = vld [vmem:[%s1855_s3 + $0x78] sm:$0xff] }
  0x15   : > { %1289 = vmatprep.subr.bf16.mxu1 %v1288_v6  ;;  %1315 = vmatpush3.bf16.msra.mxu0 %v1651_v48  ;;  %v1740_v15 = vpack.c.bf16 %v478_v14, %v477_v12 }
  0x16   : > { %1317 = vmatprep.subr.bf16.mxu0 %v1654_v49 }
  0x17   : > { %1230 = vmatmul.mubr.msk.f32.vlgmr.msra.gmra.mrb[0].mxu1 %vm229_vm0, %v228_v9 }
  0x18   : > { %1291 = vmatpush3.bf16.msra.mxu1 %v1288_v6  ;;  %v475_v6 = vld [vmem:[%s1855_s3 + $0x60] sm:$0xff] }
  0x19   : > { %1293 = vmatprep.subr.bf16.mxu1 %v1292_v10  ;;  %1319 = vmatpush3.bf16.msra.mxu0 %v1665_v52  ;;  %v1721_v8 = vpack.c.bf16 %v476_v7, %v475_v6 }
  0x1a   : > { %1321 = vmatprep.subr.bf16.mxu0 %v1675_v55 }
  0x1c   : > { %1295 = vmatpush3.bf16.msra.mxu1 %v1292_v10  ;;  %v493_v10 = vld [vmem:[%s1855_s3 + $0xf0] sm:$0xff] }
  0x1d   : > { %1297 = vmatprep.subr.bf16.mxu1 %v1296_v13  ;;  %1323 = vmatpush3.bf16.msra.mxu0 %v1683_v58 }
  0x1e   : > { %1325 = vmatprep.subr.bf16.mxu0 %v1694_v62 }
  0x20   : > { %1299 = vmatpush3.bf16.msra.mxu1 %v1296_v13  ;;  %v1735_v13 = vpack.c.bf16 %v494_v11, %v493_v10 }
  0x21   : > { %1301 = vmatprep.subr.bf16.mxu1 %v1300_v16  ;;  %1327 = vmatpush3.bf16.msra.mxu0 %v1702_v1 }
  0x22   : > { %1329 = vmatprep.subr.bf16.mxu0 %v1713_v5 }
  0x24   : > { %1303 = vmatpush3.bf16.msra.mxu1 %v1300_v16 }
  0x25   : > { %1336 = vmatprep.subr.bf16.mxu1 %v1475_v29  ;;  %1331 = vmatpush3.bf16.msra.mxu0 %v1721_v8 }
  0x26   : > { %1333 = vmatprep.subr.bf16.mxu0 %v1735_v13 }
  0x29   : > { %1335 = vmatpush3.bf16.msra.mxu0 %v1740_v15 }
  0x2a   : > { %1374 = vmatprep.subr.bf16.mxu0 %v1475_v29 }
  0xea   : > { %v1231_v17 = vpop.f32.mrb[0].mxu1 }
  0xeb   : > { %v302_v18 = vpop.f32.mrb[1].mxu1 }
  0xec   : > { %1248 = vmatprep.mubr.msk.f32.mxu1 %vm319_vm1, %v302_v18 }
  0xed   : > { %1249 = vmatmul.mubr.msk.f32.vlgmr.msra.gmra.mrb[2].mxu1 %vm319_vm1, %v1231_v17 }
  0xee   : > { %1259 = vmatprep.mubr.msk.f32.mxu1 %vm1476_vm4, %v1472_v19  ;;  %1338 = vmatpush3.bf16.msra.mxu1 %v1623_v39 }
  0xef   : > { %1339 = vmatprep.subr.bf16.mxu1 %v1475_v29 }
  0xf2   : > { %1341 = vmatpush3.bf16.msra.mxu1 %v1641_v45 }
  0xf3   : > { %1343 = vmatprep.subr.bf16.mxu1 %v1583_v25 }
 0x1c0   : > { %v1571_v20 = vpop.f32.mrb[2].mxu1 }
 0x1c1   : > { %v392_v21 = vpop.f32.mrb[3].mxu1 }
 0x1c2   : > { %410 = vrot.lane.b32.xlu0 %v392_v21, %s1473_s21 }
 0x1c6   : > { %415 = vrot.lane.b32.xlu0 %v392_v21, %s1474_s23  ;;  %s224_s23 = scalar_lea.vmem %s1857_s5, %s1089_s22 }
 0x234   : > { %v411_v59 = vpop.permute.xlu0 %410 }
 0x235   : > { %414 = vst.msk [vmem:[#allocation2 + $0x1] sm:$0xff] %vm413_vm5, %v411_v59 }
 0x238   : > { %v416_v2 = vpop.permute.xlu0 %415 }
 0x239   : > { %419 = vst.msk [vmem:[#allocation2 + $0x11] sm:$0xff] %vm413_vm5, %v416_v2 }
 0x23c   : > { %v428_v9 = vld [vmem:[#allocation2 + $0x2] sm:$0xff] }
 0x23d   : > { %453 = vrot.lane.b32.xlu1 %v428_v9, %s1477_s25  ;;  %v427_v16 = vld [vmem:[#allocation2 + $0x1] sm:$0xff] }
 0x23e   : > { %v426_v22 = vld [vmem:[#allocation2] sm:$0xff] }
 0x240   : > { %v642_v17 = vld [vmem:[#allocation2 + $0x11] sm:$0xff] }
 0x241   : > { %421 = vrot.lane.b32.xlu1 %v1571_v20, %s1473_s21  ;;  %v1439_v18 = vpack.i.bf16 %v642_v17, %v427_v16  ;;  %v1745_v21 = vld [vmem:[#allocation2 + $0x10] sm:$0xff]  ;;  %s1481_s21 = smov 64  }
 0x242   : > { %v643_v23 = vld [vmem:[#allocation2 + $0x12] sm:$0xff]  ;;  %v1449_v24 = vpack.i.bf16 %v1745_v21, %v426_v22 }
 0x243   : > { %1440 = vrot.lane.b32.xlu0 %v1439_v18, %s1478_s9  ;;  %v1454_v20 = vpack.i.bf16 %v643_v23, %v428_v9 }
 0x245   : > { %1445 = vrot.lane.b32.xlu1 %v1439_v18, %s1479_s10 }
 0x247   : > { %1450 = vrot.lane.b32.xlu0 %v1449_v24, %s1480_s11 }
 0x249   : > { %1455 = vrot.lane.b32.xlu1 %v1454_v20, %s1481_s21  ;;  %v1002_v20 = vlaneseq }
 0x24b   : > { %1460 = vrot.lane.b32.xlu0 %v1449_v24, %s1482_s12 }
 0x24d   : > { %450 = vrot.lane.b32.xlu1 %v428_v9, %s1483_s13 }
 0x24f   : > { %437 = vrot.lane.b32.xlu0 %v427_v16, %s1484_s14 }
 0x251   : > { %665 = vrot.lane.b32.xlu1 %v643_v23, %s1483_s13 }
 0x253   : > { %652 = vrot.lane.b32.xlu0 %v642_v17, %s1484_s14 }
 0x255   : > { %668 = vrot.lane.b32.xlu1 %v643_v23, %s1477_s25 }
 0x2af   : > { %v454_v26 = vpop.permute.xlu1 %453 }
 0x2b0   : > { %1260 = vmatmul.mubr.msk.f32.vlgmr.msra.gmra.mrb[4].mxu1 %vm455_vm6, %v454_v26  ;;  %v1003_v26 = vshrl.u32 %v1002_v20, 7 }
 0x2b1   : > { %1345 = vmatpush3.bf16.msra.mxu1 %v1597_v30 }
 0x2b2   : > { %1347 = vmatprep.subr.bf16.mxu1 %v1599_v31 }
 0x2b3   : > { %v422_v27 = vpop.permute.xlu1 %421 }
 0x2b4   : > { %425 = vst.msk [vmem:[#allocation2 + $0x21] sm:$0xff] %vm413_vm5, %v422_v27 }
 0x2b5   : > { %1349 = vmatpush3.bf16.msra.mxu1 %v1621_v38  ;;  %v1441_v28 = vpop.permute.xlu0 %1440 }
 0x2b6   : > { %1351 = vmatprep.subr.bf16.mxu1 %v1629_v41  ;;  %v1442_v35 = vunpack.i.l.bf16 %v1441_v28  ;;  %v1443_v59 = vunpack.i.h.bf16 %v1441_v28  ;;  %v1008_v28 = vsub.s32 1, %v1003_v26 }
 0x2b7   : > { %v1446_v32 = vpop.permute.xlu1 %1445 }
 0x2b8   : > { %v1447_v33 = vunpack.i.l.bf16 %v1446_v32  ;;  %v1448_v46 = vunpack.i.h.bf16 %v1446_v32 }
 0x2b9   : > { %1353 = vmatpush3.bf16.msra.mxu1 %v1651_v48  ;;  %v1451_v34 = vpop.permute.xlu0 %1450 }
 0x2ba   : > { %1355 = vmatprep.subr.bf16.mxu1 %v1654_v49  ;;  %v1452_v36 = vunpack.i.l.bf16 %v1451_v34  ;;  %v460_v44 = vsel %vm455_vm6, %v1442_v35, %v1447_v33  ;;  %v673_v2 = vsel %vm455_vm6, %v1443_v59, %v1448_v46  ;;  %v1453_v7 = vunpack.i.h.bf16 %v1451_v34  ;;  %v1000_v33 = vld [vmem:[%s1856_s4] sm:$0x3] }
 0x2bb   : > { %v1456_v37 = vpop.permute.xlu1 %1455  ;;  %v819_v40 = vld [vmem:[#allocation2 + $0x21] sm:$0xff] }
 0x2bc   : > { %v1457_v42 = vunpack.i.l.bf16 %v1456_v37  ;;  %835 = vrot.lane.b32.xlu1 %v819_v40, %s1479_s10  ;;  %832 = vrot.lane.b32.xlu0 %v819_v40, %s1478_s9  ;;  %v1458_v51 = vunpack.i.h.bf16 %v1456_v37  ;;  %v820_v54 = vld [vmem:[#allocation2 + $0x22] sm:$0xff]  ;;  %v456_v57 = vsel %vm455_vm6, %v426_v22, %v1452_v36  ;;  %v670_v12 = vsel %vm455_vm6, %v1745_v21, %v1453_v7 }
 0x2bd   : > { %1357 = vmatpush3.bf16.msra.mxu1 %v1665_v52  ;;  %v1461_v43 = vpop.permute.xlu0 %1460  ;;  %v1774_v56 = vld [vmem:[#allocation2 + $0x20] sm:$0xff]  ;;  %v1009_v37 = vrot.slane %v1000_v33, %v1008_v28 }
 0x2be   : > { %v1462_v47 = vunpack.i.l.bf16 %v1461_v43  ;;  %1359 = vmatprep.subr.bf16.mxu1 %v1675_v55  ;;  %v461_v50 = vsel %vm319_vm1, %v460_v44, %v1457_v42  ;;  %v674_v4 = vsel %vm319_vm1, %v673_v2, %v1458_v51  ;;  %v1463_v9 = vunpack.i.h.bf16 %v1461_v43 }
 0x2bf   : > { %v451_v53 = vpop.permute.xlu1 %450  ;;  %v1004_v42 = vsub.s32 0, %v1003_v26 }
 0x2c0   : > { %839 = vrot.lane.b32.xlu1 %v820_v54, %s1481_s21  ;;  %822 = vrot.lane.b32.xlu0 %v1774_v56, %s1480_s11  ;;  %v462_v60 = vsel %vm458_vm7, %v461_v50, %v451_v53  ;;  %v457_v61 = vsel %vm319_vm1, %v456_v57, %v1462_v47  ;;  %v671_v14 = vsel %vm319_vm1, %v670_v12, %v1463_v9 }
 0x2c1   : > { %1361 = vmatpush3.bf16.msra.mxu1 %v1683_v58  ;;  %565 = vmatprep.mubr.f32.mxu0 %v462_v60  ;;  %v438_v63 = vpop.permute.xlu0 %437  ;;  %v1005_v44 = vrot.slane %v1000_v33, %v1004_v42 }
 0x2c2   : > { %1363 = vmatprep.subr.bf16.mxu1 %v1694_v62  ;;  %v459_v0 = vsel %vm458_vm7, %v457_v61, %v438_v63 }
 0x2c3   : > { %v666_v3 = vpop.permute.xlu1 %665  ;;  %566 = vmatmul.mubr.f32.vlgmr.msra.gmra.mrb[0].mxu0 %v459_v0 }
 0x2c4   : > { %1376 = vmatpush3.bf16.msra.mxu0 %v1623_v39  ;;  %842 = vrot.lane.b32.xlu1 %v820_v54, %s1483_s13  ;;  %v675_v6 = vsel %vm458_vm7, %v674_v4, %v666_v3 }
 0x2c5   : > { %1365 = vmatpush3.bf16.msra.mxu1 %v1702_v1  ;;  %825 = vrot.lane.b32.xlu0 %v1774_v56, %s1482_s12  ;;  %v653_v11 = vpop.permute.xlu0 %652 }
 0x2c6   : > { %742 = vmatprep.mubr.f32.mxu1 %v675_v6  ;;  %1377 = vmatprep.subr.bf16.mxu0 %v1475_v29  ;;  %v672_v16 = vsel %vm458_vm7, %v671_v14, %v653_v11 }
 0x2c7   : > { %1367 = vmatprep.subr.bf16.mxu1 %v1713_v5  ;;  %1270 = vmatprep.mubr.msk.f32.mxu0 %vm1476_vm4, %v1472_v19  ;;  %v669_v10 = vpop.permute.xlu1 %668 }
 0x2c8   : > { %1379 = vmatpush3.bf16.msra.mxu0 %v1641_v45  ;;  %845 = vrot.lane.b32.xlu1 %v820_v54, %s1477_s25 }
 0x2c9   : > { %1369 = vmatpush3.bf16.msra.mxu1 %v1721_v8  ;;  %829 = vrot.lane.b32.xlu0 %v819_v40, %s1484_s14 }
 0x2ca   : > { %1371 = vmatprep.subr.bf16.mxu1 %v1735_v13  ;;  %1381 = vmatprep.subr.bf16.mxu0 %v1583_v25 }
 0x2cb   : > { %1271 = vmatmul.mubr.msk.f32.vlgmr.msra.gmra.mrb[2].mxu0 %vm455_vm6, %v669_v10 }
 0x2cc   : > { %1383 = vmatpush3.bf16.msra.mxu0 %v1597_v30 }
 0x2cd   : > { %1373 = vmatpush3.bf16.msra.mxu1 %v1740_v15  ;;  %1385 = vmatprep.subr.bf16.mxu0 %v1599_v31 }
 0x2ce   : > { %1412 = vmatprep.subr.bf16.mxu1 %v1475_v29 }
 0x2d0   : > { %743 = vmatmul.mubr.f32.vlgmr.msra.gmra.mrb[6].mxu1 %v672_v16  ;;  %1387 = vmatpush3.bf16.msra.mxu0 %v1621_v38 }
 0x2d1   : > { %1389 = vmatprep.subr.bf16.mxu0 %v1629_v41  ;;  %1414 = vmatpush3.bf16.msra.mxu1 %v1623_v39 }
 0x2d2   : > { %1415 = vmatprep.subr.bf16.mxu1 %v1475_v29  ;;  %1281 = vmatprep.mubr.msk.f32.mxu1 %vm1476_vm4, %v1472_v19 }
 0x2d4   : > { %1391 = vmatpush3.bf16.msra.mxu0 %v1651_v48 }
 0x2d5   : > { %1393 = vmatprep.subr.bf16.mxu0 %v1654_v49  ;;  %1417 = vmatpush3.bf16.msra.mxu1 %v1641_v45 }
 0x2d8   : > { %1395 = vmatpush3.bf16.msra.mxu0 %v1665_v52 }
 0x2d9   : > { %1397 = vmatprep.subr.bf16.mxu0 %v1675_v55 }
 0x2dc   : > { %1399 = vmatpush3.bf16.msra.mxu0 %v1683_v58 }
 0x2dd   : > { %1401 = vmatprep.subr.bf16.mxu0 %v1694_v62 }
 0x2e0   : > { %1403 = vmatpush3.bf16.msra.mxu0 %v1702_v1 }
 0x2e1   : > { %1405 = vmatprep.subr.bf16.mxu0 %v1713_v5 }
 0x2e4   : > { %1407 = vmatpush3.bf16.msra.mxu0 %v1721_v8 }
 0x2e5   : > { %1409 = vmatprep.subr.bf16.mxu0 %v1735_v13 }
 0x2e8   : > { %1411 = vmatpush3.bf16.msra.mxu0 %v1740_v15 }
 0x32e   : > { %v836_v19 = vpop.permute.xlu1 %835  ;;  %v833_v25 = vpop.permute.xlu0 %832 }
 0x32f   : > { %v850_v31 = vsel %vm455_vm6, %v833_v25, %v836_v19 }
 0x332   : > { %v840_v29 = vpop.permute.xlu1 %839  ;;  %v823_v30 = vpop.permute.xlu0 %822 }
 0x333   : > { %v851_v38 = vsel %vm319_vm1, %v850_v31, %v840_v29  ;;  %v847_v48 = vsel %vm455_vm6, %v1774_v56, %v823_v30 }
 0x336   : > { %v843_v39 = vpop.permute.xlu1 %842 }
 0x337   : > { %v826_v41 = vpop.permute.xlu0 %825  ;;  %v852_v45 = vsel %vm458_vm7, %v851_v38, %v843_v39 }
 0x338   : > { %919 = vmatprep.mubr.f32.mxu0 %v852_v45  ;;  %v848_v52 = vsel %vm319_vm1, %v847_v48, %v826_v41 }
 0x33a   : > { %v846_v49 = vpop.permute.xlu1 %845 }
 0x33b   : > { %v830_v55 = vpop.permute.xlu0 %829  ;;  %1282 = vmatmul.mubr.msk.f32.vlgmr.msra.gmra.mrb[8].mxu1 %vm455_vm6, %v846_v49 }
 0x33c   : > { %v849_v58 = vsel %vm458_vm7, %v848_v52, %v830_v55 }
 0x33d   : > { %920 = vmatmul.mubr.f32.vlgmr.msra.gmra.mrb[4].mxu0 %v849_v58 }
 0x383   : > { %v637_v62 = vpop.f32.mrb[4].mxu1 }
 0x384   : > { %v1261_v1 = vpop.f32.mrb[5].mxu1 }
 0x396   : > { %v1137_v5 = vpop.f32.mrb[0].mxu0 }
 0x397   : > { %v1138_v8 = vpop.f32.mrb[1].mxu0 }
 0x398   : > { %v1139_v13 = vadd.f32 %v1138_v8, %v1137_v5 }
 0x39a   : > { %v638_v15 = vadd.f32 %v1139_v13, %v637_v62 }
 0x39e   : > { %v814_v17 = vpop.f32.mrb[2].mxu0 }
 0x39f   : > { %v1272_v18 = vpop.f32.mrb[3].mxu0 }
 0x3a3   : > { %v1177_v21 = vpop.f32.mrb[6].mxu1 }
 0x3a4   : > { %v1178_v22 = vpop.f32.mrb[7].mxu1 }
 0x3a5   : > { %v1179_v23 = vadd.f32 %v1178_v22, %v1177_v21 }
 0x3a7   : > { %v815_v24 = vadd.f32 %v1179_v23, %v814_v17 }
 0x3a9   : > { %996 = vrot.lane.b32.xlu0 %v815_v24, %s1481_s21 }
 0x40e   : > { %v991_v27 = vpop.f32.mrb[8].mxu1 }
 0x40f   : > { %v1283_v32 = vpop.f32.mrb[9].mxu1 }
 0x410   : > { %v1217_v34 = vpop.f32.mrb[4].mxu0 }
 0x411   : > { %v1218_v35 = vpop.f32.mrb[5].mxu0 }
 0x412   : > { %v1219_v36 = vadd.f32 %v1218_v35, %v1217_v34 }
 0x414   : > { %v992_v40 = vadd.f32 %v1219_v36, %v991_v27 }
 0x416   : > { %v1013_v43 = vadd.f32 %v1009_v37, %v992_v40 }
 0x418   : > { %1015 = vst.msk [vmem:[%s224_s23 + $0x8] sm:$0xff] %vm319_vm1, %v1013_v43 }
 0x41b   : > { %v997_v46 = vpop.permute.xlu0 %996 }
 0x41c   : > { %v999_v47 = vsel %vm319_vm1, %v638_v15, %v997_v46 }
 0x41d   : > { %v1012_v50 = vadd.f32 %v1005_v44, %v999_v47 }
 0x41f   : > { %1014 = vst [vmem:[%s224_s23] sm:$0xff] %v1012_v50 }
 0x420 PF: > { %s15_s18 = sadd.s32 1, %s1470_s18  }
 0x421   : > { %p12_p4 = scmp.ge.s32.totalorder %s15_s18, 4  }
 0x423   :  { %14 = sbr.rel (!%p12_p4) target bundleno = 1 (0x1), region = 72 }

</bundles_post_ra>
